<compile_context>
chip_gen: v7x
topology: tpu7x:2x2x1
jax: 0.10.0
libtpu: 0.0.40
codegen_flags: <defaults>
</compile_context>

<pallas_src>
import jax
import jax.numpy as jnp
from jax.experimental import pallas as pl
from jax.experimental.pallas import tpu as pltpu


# ----------------------------- kernels --------------------------------------


def _invconv_kernel_2d(w_ref, x_ref, o_ref):
    # w_ref: (C, C)     resident weight (constant block index)
    # x_ref: (C, t_hw)  lane-dense pixel tile of one batch element
    # o_ref: (C, t_hw)  out = W @ x
    o_ref[...] = jnp.dot(
        w_ref[...], x_ref[...], preferred_element_type=jnp.float32
    ).astype(o_ref.dtype)


def _invconv_kernel_3d(w_ref, x_ref, o_ref):
    # w_ref: (C, C)          resident weight
    # x_ref: (nb, C, t_hw)   nb batch elements folded into one grid step
    # o_ref: (nb, C, t_hw)   out[b] = W @ x[b]
    o_ref[...] = jnp.einsum(
        "oc,bct->bot", w_ref[...], x_ref[...],
        preferred_element_type=jnp.float32,
    ).astype(o_ref.dtype)


# --------------------------- tile selection ----------------------------------


def _round_down_128(v):
    return (v // 128) * 128


def _choose_tiling(n, c, hw, itemsize,
                   budget_bytes=48 << 20,        # <= ~48 MiB working set (v7x-safe)
                   target_step_bytes=4 << 20):   # aim for >= 4 MB of x per step
    """Pick (nb, t_hw, vmem_limit_bytes) from a single VMEM budget.

    Working set per grid step (double buffered in + out, resident weight):
        ws = 2*(nb*c*t_hw) + 2*(nb*c*t_hw) + 2*c*c   elements.
    """
    w_bytes = 2 * c * c * itemsize
    avail = max(budget_bytes - w_bytes, 1 << 20)
    per_col = 4 * c * itemsize  # in + out, double buffered, per HW column, per batch elem

    # --- H*W tile: lane-aligned, as large as the budget allows ---------------
    if hw <= 128:
        t_hw = hw  # full extent (always a legal block shape)
    else:
        max_cols = max(avail // per_col, 128)
        t_hw = max(128, min(_round_down_128(hw), _round_down_128(max_cols)))
        # Prefer an even split of hw (avoids a heavily-masked ragged last tile),
        # but only if it doesn't cost more than ~2x in tile size.
        if hw % t_hw != 0:
            for cand in range(t_hw, max(t_hw // 2, 127), -128):
                if hw % cand == 0:
                    t_hw = cand
                    break

    # --- batch blocking: fold batch elements when HW alone is too small ------
    nb = 1
    step_bytes = c * t_hw * itemsize
    hw_exhausted = (hw <= 128) or (t_hw == _round_down_128(hw))
    if n > 1 and hw_exhausted and step_bytes < target_step_bytes:
        want = min(n, max(1, target_step_bytes // max(step_bytes, 1)))
        fit = max(1, avail // max(per_col * t_hw, 1))
        nb = int(min(want, fit))
        while nb > 1 and n % nb != 0:   # keep batch blocks un-ragged
            nb -= 1

    # --- guarantee >= 2 grid steps (v7x has 2 TensorCores) -------------------
    def _steps(nb_, t_):
        return (-(-n // nb_)) * (-(-hw // t_))

    if _steps(nb, t_hw) < 2:
        if nb > 1:
            nb = max(1, n // 2)
            while nb > 1 and n % nb != 0:
                nb -= 1
        elif t_hw >= 256:
            t_hw = max(128, _round_down_128(t_hw // 2))
        # else: single tiny step; nothing worth splitting.

    ws = 4 * nb * c * t_hw * itemsize + w_bytes
    vmem_limit = int(min(60 << 20, max(32 << 20, ws * 5 // 4)))  # ~20-25% headroom
    return nb, t_hw, vmem_limit


# ------------------------------ wrapper --------------------------------------


@jax.jit
def invconv2d_forward(x, weight):
    """Forward of InvConv2d.

    Args:
      x:      (N, C, H, W) float32, NCHW like the PyTorch module.
      weight: (C, C) float32 (the squeezed (C, C, 1, 1) conv weight).

    Returns:
      out:    (N, C, H, W) float32, out[n,o,h,w] = sum_c W[o,c] * x[n,c,h,w]
      logdet: scalar float32, H * W * slogdet(W)[1]
    """
    n, c, h, w = x.shape
    hw = h * w
    itemsize = jnp.dtype(x.dtype).itemsize

    # Zero-copy view: NCHW tensor is already (N, C, H*W)-contiguous.
    x3 = x.reshape(n, c, hw)

    nb, t_hw, vmem_limit = _choose_tiling(n, c, hw, itemsize)
    n_b_tiles = pl.cdiv(n, nb)
    n_hw_tiles = pl.cdiv(hw, t_hw)

    if nb == 1:
        kernel = _invconv_kernel_2d
        x_spec = pl.BlockSpec((None, c, t_hw), lambda b, j: (b, 0, j))
        o_spec = pl.BlockSpec((None, c, t_hw), lambda b, j: (b, 0, j))
    else:
        kernel = _invconv_kernel_3d
        x_spec = pl.BlockSpec((nb, c, t_hw), lambda b, j: (b, 0, j))
        o_spec = pl.BlockSpec((nb, c, t_hw), lambda b, j: (b, 0, j))

    cost = pl.CostEstimate(
        flops=2 * n * c * c * hw,
        transcendentals=0,
        bytes_accessed=2 * n * c * hw * itemsize + c * c * itemsize,
    )

    out3 = pl.pallas_call(
        kernel,
        out_shape=jax.ShapeDtypeStruct((n, c, hw), x.dtype),
        grid_spec=pltpu.PrefetchScalarGridSpec(
            num_scalar_prefetch=0,
            grid=(n_b_tiles, n_hw_tiles),
            in_specs=[
                pl.BlockSpec((c, c), lambda b, j: (0, 0)),  # W, resident
                x_spec,
            ],
            out_specs=o_spec,
        ),
        compiler_params=pltpu.CompilerParams(
            # Both grid axes are independent -> megacore sharding on v7x.
            dimension_semantics=("parallel", "parallel"),
            vmem_limit_bytes=vmem_limit,
        ),
        cost_estimate=cost,
    )(weight, x3)

    out = out3.reshape(n, c, h, w)

    # --- glue: logdet (parameter-only, C x C matrix) ---
    # TODO(synk): PyTorch computes slogdet in float64; TPU default is float32.
    _, logabsdet = jnp.linalg.slogdet(weight)
    logdet = (h * w) * logabsdet.astype(jnp.float32)

    return out, logdet


def init_invconv_weight(key, in_channel):
    """Deterministic init matching the module: randn -> QR -> orthogonal Q."""
    w = jax.random.normal(key, (in_channel, in_channel), dtype=jnp.float32)
    q, _ = jnp.linalg.qr(w)
    return q  # (C, C); the conv weight is q[:, :, None, None]


# ------------------------------- smoke test ----------------------------------


def _check(n, c, h, w, key):
    k_w, k_x = jax.random.split(key)
    weight = init_invconv_weight(k_w, c)
    x = jax.random.normal(k_x, (n, c, h, w), dtype=jnp.float32)

    out, logdet = invconv2d_forward(x, weight)
    out = jax.block_until_ready(out)
    logdet = jax.block_until_ready(logdet)

    # Reference check in plain JAX (1x1 conv == channel matmul).
    ref_out = jnp.einsum("oc,nchw->nohw", weight, x)
    ref_logdet = (h * w) * jnp.linalg.slogdet(weight)[1]
    assert out.shape == (n, c, h, w)
    assert jnp.allclose(out, ref_out, atol=1e-4, rtol=1e-4), (n, c, h, w)
    assert jnp.allclose(logdet, ref_logdet, atol=1e-4, rtol=1e-4), (n, c, h, w)


if __name__ == "__main__":
    key = jax.random.PRNGKey(0)
    keys = jax.random.split(key, 3)

    # Main smoke shape (nb=1 path, single lane-aligned HW tile per batch elem).
    _check(2, 4, 16, 16, keys[0])
    # Batch-blocked path (nb>1, batched einsum kernel).
    _check(4, 8, 8, 8, keys[1])
    # Ragged last HW tile (144 = 128 + 16) with batch blocking.
    _check(2, 8, 12, 12, keys[2])

    print("KERNEL_OK")
</pallas_src>

<mosaic_0001>
module attributes {stable_mosaic.version = 11 : i64} {
  func.func @_invconv_kernel_2d(%arg0: i32, %arg1: i32, %arg2: memref<4x4xf32, #tpu.memory_space<vmem>>, %arg3: memref<1x4x256xf32, #tpu.memory_space<vmem>>, %arg4: memref<1x4x256xf32, #tpu.memory_space<vmem>>) attributes {dimension_semantics = [#tpu.dimension_semantics<parallel>, #tpu.dimension_semantics<parallel>], iteration_bounds = array<i64: 2, 1>, scalar_prefetch = 0 : i64, scratch_operands = 0 : i64, tpu.core_type = #tpu.core_type<tc>, window_params = [{pipeline_mode = #tpu.pipeline_mode<synchronous>, transform_indices = @transform_0, window_bounds = array<i64: 4, 4>}, {transform_indices = @transform_1, window_bounds = array<i64: 1, 4, 256>}, {transform_indices = @transform_2, window_bounds = array<i64: 1, 4, 256>}]} {
    %c0 = arith.constant 0 : index
    %c0_0 = arith.constant 0 : index
    %0 = vector.load %arg2[%c0, %c0_0] : memref<4x4xf32, #tpu.memory_space<vmem>>, vector<4x4xf32>
    %c0_1 = arith.constant 0 : index
    %c0_2 = arith.constant 0 : index
    %c0_3 = arith.constant 0 : index
    %1 = vector.load %arg3[%c0_1, %c0_2, %c0_3] : memref<1x4x256xf32, #tpu.memory_space<vmem>>, vector<1x4x256xf32>
    %2 = vector.shape_cast %1 : vector<1x4x256xf32> to vector<4x256xf32>
    %cst = arith.constant dense<0.000000e+00> : vector<4x256xf32>
    %3 = tpu.matmul %0, %2, %cst {dimension_numbers = #tpu.dot_dimension_numbers<[1], [0], [0], [1], [0, 0, 1, 1], [], []>} : vector<4x4xf32>, vector<4x256xf32>, vector<4x256xf32> -> vector<4x256xf32>
    %c0_4 = arith.constant 0 : index
    %c0_5 = arith.constant 0 : index
    %c0_6 = arith.constant 0 : index
    %4 = vector.load %arg4[%c0_4, %c0_5, %c0_6] : memref<1x4x256xf32, #tpu.memory_space<vmem>>, vector<1x4x256xf32>
    %5 = vector.shape_cast %4 : vector<1x4x256xf32> to vector<4x256xf32>
    %6 = vector.shape_cast %3 : vector<4x256xf32> to vector<1x4x256xf32>
    tpu.vector_store %arg4[%c0_4, %c0_5, %c0_6], %6 {strides = array<i32>} : memref<1x4x256xf32, #tpu.memory_space<vmem>>, vector<1x4x256xf32>,
    return
  }
  func.func @transform_0(%arg0: i32, %arg1: i32) -> (i32, i32) {
    %c0_i32 = arith.constant 0 : i32
    %c0_i32_0 = arith.constant 0 : i32
    %c0_i32_1 = arith.constant 0 : i32
    return %c0_i32, %c0_i32_0 : i32, i32
  }
  func.func @transform_1(%arg0: i32, %arg1: i32) -> (i32, i32, i32) {
    %c0_i32 = arith.constant 0 : i32
    %c0_i32_0 = arith.constant 0 : i32
    return %arg0, %c0_i32, %arg1 : i32, i32, i32
  }
  func.func @transform_2(%arg0: i32, %arg1: i32) -> (i32, i32, i32) {
    %c0_i32 = arith.constant 0 : i32
    %c0_i32_0 = arith.constant 0 : i32
    return %arg0, %c0_i32, %arg1 : i32, i32, i32
  }
}

</mosaic_0001>

<bundles_post_ra>
// kernel: custom-call.2
= control target key start
LH: loop header
LB: loop body
LE: loop exit
PB: predicated region body
PF: predicated region fallthrough
CT: control target
= control target key end

     0   :  { %5 = vsyncpa [#allocation6], 0  ;;  %s562_s0 = inlined_call_operand.vmem [shape: f32[4,4], index: 0, kind: input, shape index: {}]   ;;  %s563_s1 = inlined_call_operand.vmem [shape: f32[4,4], index: 1, kind: output, shape index: {0}]   ;;  %s564_s2 = inlined_call_operand.hbm [shape: s32[4], index: 2, kind: output, shape index: {1}]   ;;  %s565_s3 = inlined_call_operand.hbm [shape: s32[4], index: 3, kind: output, shape index: {2}]  }
   0x1   :  { %6 = vsyncpa [#allocation9], 0  ;;  %v67_v0 = vld [vmem:[%s562_s0] sm:$0xf]  ;;  %v76_v1 = vlaneseq  ;;  %v473_v2 = vmov 0   ;;  %s503_s14 = smov 0  }
   0x2   :  { %68 = vst [vmem:[#allocation1] sm:$0xf] %v67_v0  ;;  %75 = vst [vmem:[#allocation4] sm:$0x1] %v473_v2 }
   0x3   :  { %v500_v3 = vshrl.u32 %v76_v1, 7 }
   0x5   :  { %80 = vst [vmem:[#allocation10] sm:$0xff] %v500_v3 }
   0x9   :  { %v71_v4 = vld [vmem:[#allocation1] sm:$0xf] }
   0xa   :  { %72 = vst [vmem:[#allocation0] sm:$0xf] %v71_v4 }
  0x11   :  { %v73_v5 = vld [vmem:[#allocation0] sm:$0xff] }
  0x12   :  { %74 = vst [vmem:[#allocation2] sm:$0xff] %v73_v5 }
  0x13 LB: > { %vm96_vm0 = vcmp.lt.s32.totalorder %v500_v3, 4  ;;  %v510_v8 = vstv %s471_s14  ;;  %s137_s0 = ssub.s32 128, %s471_s14  ;;  %v143_v38 = vand.u32 127, %v76_v1  ;;  %v146_v40 = vld [vmem:[#allocation4] ss:$0 sm:$0xff]  ;;  %s149_s15 = scalar_lea.vmem [#allocation2], %s471_s14  ;;  %s471_s14 = sphi %s503_s14, %s86_s14  }
  0x14   : > { %vm95_vm1 = vcmp.ge.s32.totalorder %v500_v3, %v510_v8  ;;  %s155_s17 = scalar_lea.vmem [#allocation10], %s471_s14  ;;  %vm175_vm15 = vcmp.gt.s32.totalorder %v500_v3, %v510_v8  ;;  %s86_s14 = sadd.s32 1, %s471_s14  }
  0x15   : > { %vm97_vm3 = vmand %vm95_vm1, %vm96_vm0  ;;  %vm167_vm12 = vcmp.gt.s32.totalorder %v143_v38, %v510_v8  ;;  %vm144_vm13 = vcmp.eq.s32.totalorder %v143_v38, %v510_v8  ;;  %v157_v42 = vld [vmem:[%s155_s17] ss:$0 sm:$0xff]  ;;  %p83_p0 = scmp.ge.s32.totalorder %s86_s14, 4  }
  0x16   : > { %vm179_vm1 = vmand %vm175_vm15, %vm144_vm13  ;;  %s474_s20 = smov (%p83_p0), [#allocation5]  }
  0x17   :  { %s320_s21 = sshll.u32 (%p83_p0), %s474_s20, 4  ;;  %s321_s21 = int_to_ptr.vmem [resolvable:$true] %s320_s21 }
  0x18   :  { %s417_s22 = scalar_lea.vmem (%p83_p0), %s321_s21, 16  ;;  %s421_s23 = scalar_lea.vmem (%p83_p0), %s321_s21, 32 }
  0x19   : > { %v91_v6 = vld [vmem:[#allocation2] sm:$0xff]  ;;  %v151_v41 = vld [vmem:[%s149_s15] ss:$0 sm:$0xff]  ;;  %p418_p1 = scmp.ne.s32.totalorder (%p83_p0), %s321_s21, %s417_s22  ;;  %p422_p2 = scmp.lt.s32.totalorder (%p83_p0), %s321_s21, %s321_s21 }
  0x1a   : > { %v92_v7 = vand.u32 2147483647, %v91_v6  ;;  %p423_p3 = scmp.lt.s32.totalorder (%p83_p0), %s421_s23, %s417_s22 }
  0x1c   : > { %vm398_vm2 = vcmp.gt.f32.partialorder %v92_v7, -inf  ;;  %p424_p4 = por (%p83_p0), %p423_p3, %p422_p2 }
  0x1d   : > { %vm99_vm4 = vmand %vm97_vm3, %vm398_vm2 }
  0x1e   : > { %v100_v9 = vsel %vm99_vm4, %v500_v3, %v510_v8  ;;  %v101_v10 = vsel %vm99_vm4, %v92_v7, -inf  ;;  %p425_p5 = pnand (%p83_p0), %p424_p4, %p418_p1 }
  0x1f   : > { %v102_v11 = vrot.slane %v101_v10, 1  ;;  %v103_v12 = vrot.slane %v100_v9, 1 }
  0x21   : > { %vm104_vm5 = vcmp.ge.f32.partialorder %v102_v11, %v101_v10  ;;  %v107_v13 = vrot.slane %v102_v11, 1  ;;  %v108_v14 = vrot.slane %v103_v12, 1 }
  0x22   : > { %v105_v15 = vsel %vm104_vm5, %v102_v11, %v101_v10  ;;  %v106_v16 = vsel %vm104_vm5, %v103_v12, %v100_v9 }
  0x23   : > { %vm109_vm6 = vcmp.ge.f32.partialorder %v107_v13, %v105_v15  ;;  %v112_v17 = vrot.slane %v107_v13, 1  ;;  %v113_v18 = vrot.slane %v108_v14, 1 }
  0x24   : > { %v110_v19 = vsel %vm109_vm6, %v107_v13, %v105_v15  ;;  %v111_v20 = vsel %vm109_vm6, %v108_v14, %v106_v16 }
  0x25   : > { %vm114_vm7 = vcmp.ge.f32.partialorder %v112_v17, %v110_v19  ;;  %v117_v21 = vrot.slane %v112_v17, 1  ;;  %v118_v22 = vrot.slane %v113_v18, 1 }
  0x26   : > { %v115_v23 = vsel %vm114_vm7, %v112_v17, %v110_v19  ;;  %v116_v24 = vsel %vm114_vm7, %v113_v18, %v111_v20 }
  0x27   : > { %vm119_vm8 = vcmp.ge.f32.partialorder %v117_v21, %v115_v23  ;;  %v122_v25 = vrot.slane %v117_v21, 1  ;;  %v123_v26 = vrot.slane %v118_v22, 1 }
  0x28   : > { %v120_v27 = vsel %vm119_vm8, %v117_v21, %v115_v23  ;;  %v121_v28 = vsel %vm119_vm8, %v118_v22, %v116_v24 }
  0x29   : > { %vm124_vm9 = vcmp.ge.f32.partialorder %v122_v25, %v120_v27  ;;  %v127_v29 = vrot.slane %v122_v25, 1  ;;  %v128_v30 = vrot.slane %v123_v26, 1 }
  0x2a   : > { %v125_v31 = vsel %vm124_vm9, %v122_v25, %v120_v27  ;;  %v126_v32 = vsel %vm124_vm9, %v123_v26, %v121_v28 }
  0x2b   : > { %vm129_vm10 = vcmp.ge.f32.partialorder %v127_v29, %v125_v31  ;;  %v132_v33 = vrot.slane %v127_v29, 1  ;;  %v133_v34 = vrot.slane %v128_v30, 1 }
  0x2c   : > { %v130_v35 = vsel %vm129_vm10, %v127_v29, %v125_v31  ;;  %v131_v36 = vsel %vm129_vm10, %v128_v30, %v126_v32 }
  0x2d   : > { %vm134_vm11 = vcmp.ge.f32.partialorder %v132_v33, %v130_v35 }
  0x2e   : > { %v136_v37 = vsel %vm134_vm11, %v133_v34, %v131_v36 }
  0x2f   : > { %138 = vrot.lane.b32.xlu0 %v136_v37, %s137_s0 }
  0xa1   : > { %v139_v39 = vpop.permute.xlu0 %138 }
  0xa2   : > { %402 = vpush %v139_v39 }
  0xd3   : > { %s403_s16 = spop %402 }
  0xd4   : > { %v145_v43 = vstv %s403_s16  ;;  %s150_s18 = scalar_lea.vmem [#allocation2], %s403_s16  ;;  %s156_s19 = scalar_lea.vmem [#allocation10], %s403_s16 }
  0xd5   : > { %v152_v44 = vld [vmem:[%s150_s18] ss:$0 sm:$0xff]  ;;  %v147_v46 = vsel %vm144_vm13, %v145_v43, %v146_v40 }
  0xd6   : > { %v158_v45 = vld [vmem:[%s156_s19] ss:$0 sm:$0xff]  ;;  %153 = vst [vmem:[%s150_s18] sm:$0x1] %v151_v41  ;;  %vm161_vm14 = vcmp.ne.f32.partialorder %v152_v44, 0.0  ;;  %148 = vst [vmem:[#allocation4] sm:$0x1] %v147_v46 }
  0xd7   : > { %159 = vst [vmem:[%s156_s19] sm:$0x1] %v157_v42  ;;  %154 = vst [vmem:[%s149_s15] sm:$0x1] %v152_v44  ;;  %v168_v53 = vsel %vm167_vm12, %v152_v44, 0.0 }
  0xd8   : > { %160 = vst [vmem:[%s155_s17] sm:$0x1] %v158_v45  ;;  %vm162_vm0 = vmand %vm144_vm13, %vm161_vm14 }
  0xd9   : > { %v163_v47 = vsel %vm162_vm0, %v152_v44, 1.0 }
  0xda   : > { %v176_v48 = vsel %vm175_vm15, %v163_v47, 1.0 }
  0xdb   : > { %415 = vrcp.f32 %v176_v48 }
  0xdd   :  { %v244_v59 = vld [vmem:[#allocation4] sm:$0x1] (%p83_p0) }
  0xde   : > { %v172_v50 = vld [vmem:[#allocation2] sm:$0xff]  ;;  %246 = vst [vmem:[#allocation5] sm:$0x1] (%p83_p0), %v244_v59 }
  0xdf   :  { %v186_v57 = vld [vmem:[#allocation10] sm:$0xff] (%p83_p0) }
  0xe5   : > { %v416_v49 = vpop.eup %415 }
  0xe6   : > { %v178_v51 = vmul.f32 %v416_v49, %v172_v50 }
  0xe8   : > { %v180_v52 = vsel %vm179_vm1, %v178_v51, 0.0 }
  0xe9   : > { %181 = vadd.xlane.f32.xlu0 %v180_v52 }
 0x116   :  { %202 = vxpose.xlu0.b32.start.end [1/1] (short) (narrow) (%p83_p0), %v186_v57, 8 }
 0x175   :  { %85 = sbr.rel (!%p83_p0) target bundleno = 19 (0x13), region = 134 }
 0x176   : > { %v182_v54 = vpop.xlane.xlu0 %181 }
 0x177   : > { %v183_v55 = vmul.f32 %v182_v54, %v168_v53 }
 0x179   : > { %v184_v56 = vsub.f32 %v178_v51, %v183_v55 }
 0x17b   : > { %185 = vst [vmem:[#allocation2] sm:$0xff] %v184_v56 }
 0x182   :  { %v238_v58 = vld [vmem:[#allocation2] sm:$0xf] }
 0x183   :  { %240 = vst [vmem:[#allocation3] sm:$0xf] %v238_v58 }
 0x184   :  { %428 = shalt.err (!%p425_p5)
}
 0x185   :  { %s429_s26 = scalar_lea.hbm %s564_s2, 16 }
 0x186   :  { %p430_p6 = scmp.ne.s32.totalorder %s564_s2, %s429_s26  ;;  %p433_p7 = scmp.lt.u32.totalorder %s429_s26, %s564_s2 }
 0x188   :  { %p435_p8 = pnand %p433_p7, %p430_p6 }
 0x18a   :  { %438 = shalt.err (!%p435_p8)
}
 0x18b   :  { %323 = dma.vmem_to_hbm [thread:$0]  %s321_s21, 16, %s564_s2, [#allocation6]   ;;  %v313_v60 = vld [vmem:[#allocation3] sm:$0xf] }
 0x18c   :  { %314 = vst [vmem:[%s563_s1] sm:$0xf] %v313_v60  ;;  %s475_s8 = smov [#allocation8]  }
 0x18d   :  { %s329_s9 = sshll.u32 %s475_s8, 4  ;;  %s330_s9 = int_to_ptr.vmem [resolvable:$true] %s329_s9 }
 0x18e   :  { %s439_s10 = scalar_lea.vmem %s330_s9, 16  ;;  %s443_s11 = scalar_lea.vmem %s330_s9, 32 }
 0x18f   :  { %p440_p9 = scmp.ne.s32.totalorder %s330_s9, %s439_s10  ;;  %p444_p10 = scmp.lt.s32.totalorder %s330_s9, %s330_s9 }
 0x190   :  { %p445_p11 = scmp.lt.s32.totalorder %s443_s11, %s439_s10 }
 0x192   :  { %p446_p12 = por %p445_p11, %p444_p10 }
 0x194   :  { %p447_p13 = pnand %p446_p12, %p440_p9 }
 0x196   :  { %v218_v61 = vpop.trf.xlu0 }
 0x197   :  { %234 = vst [vmem:[#allocation7] sm:$0x1] %v218_v61 }
 0x19e   :  { %v250_v62 = vld [vmem:[#allocation7] sm:$0x1] }
 0x19f   :  { %252 = vst [vmem:[#allocation8] sm:$0x1] %v250_v62 }
 0x1a0   :  { %450 = shalt.err (!%p447_p13)
}
 0x1a1   :  { %s451_s13 = scalar_lea.hbm %s565_s3, 16 }
 0x1a2   :  { %p452_p0 = scmp.ne.s32.totalorder %s565_s3, %s451_s13  ;;  %p455_p1 = scmp.lt.u32.totalorder %s451_s13, %s565_s3 }
 0x1a4   :  { %p457_p2 = pnand %p455_p1, %p452_p0 }
 0x1a6   :  { %460 = shalt.err (!%p457_p2)
}
 0x1a7   :  { %332 = dma.vmem_to_hbm [thread:$0]  %s330_s9, 16, %s565_s3, [#allocation9]  }
 0x1a8   :  { %465 = dma.done.wait [#allocation6], 16  }
 0x1a9   :  { %466 = vsyncadd [#allocation6], 4294967280 }
 0x1aa   :  { %467 = dma.done.wait [#allocation9], 16  }
 0x1ab   :  { %468 = vsyncadd [#allocation9], 4294967280 }
 0x1ac   :  { %339 = vsyncpa [#allocation6], 1 }
 0x1ad   :  { %340 = vsyncpa [#allocation9], 1 }

// kernel: invconv2d_forward.1
= control target key start
LH: loop header
LB: loop body
LE: loop exit
PB: predicated region body
PF: predicated region fallthrough
CT: control target
= control target key end

     0   :  { %s441_s9 = smov 0   ;;  %s443_s10 = smov 0   ;;  %s474_s0 = inlined_call_operand.vmem [shape: f32[4,4], index: 0, kind: input, shape index: {}]   ;;  %s475_s1 = inlined_call_operand.vmem [shape: f32[2,4,256], index: 1, kind: input, shape index: {}]   ;;  %s476_s2 = inlined_call_operand.vmem [shape: f32[2,4,256], index: 2, kind: output, shape index: {}]  }
   0x1   :  { %s445_s11 = smov 0  }
   0x2 LB: > { %s24_s12 = sadd.s32 1, %s419_s10  ;;  %p363_p0 = scmp.ge.s32.totalorder %s423_s11, 1  ;;  %s423_s11 = sphi %s445_s11, %s12_s11   ;;  %s419_s10 = sphi %s443_s10, %s478_s10   ;;  %s415_s9 = sphi %s441_s9, %s477_s9  }
   0x3   : > { %p26_p1 = scmp.ge.s32.totalorder %s24_s12, 2  ;;  %p133_p2 = scmp.lt.s32.totalorder %s423_s11, 3 }
   0x5   : > { %s480_s12 = smov (%p26_p1, %s24_s12), 0  ;;  %p134_p3 = pnand %p363_p0, %p133_p2 }
   0x6   : > { %p164_p4 = scmp.lt.s32.totalorder (!%p134_p3), %s415_s9, 1  ;;  %v425_v0 = vmov (!%p134_p3), 0.0   ;;  %vm191_vm0 = vcmask (!%p134_p3), 1043456   ;;  %v183_v3 = vld [vmem:[%s474_s0] sm:$0xf] (!%p134_p3)  ;;  %vm187_vm1 = vcmask (!%p134_p3), 31744  }
   0x7   : > { %137 = sbr.rel (%p134_p3) target bundleno = 238 (0xee), region = 28  ;;  %260 = vmatprep.mubr.f32.mxu0 (!%p134_p3), %v425_v0 }
   0xe   : > { %s482_s9 = smov (!%p164_p4, %s415_s9), 1 }
   0xf   : > { %s373_s13 = sshll.u32 %s482_s9, 3 }
  0x10   : > { %s171_s16 = scalar_lea.vmem %s475_s1, %s373_s13  ;;  %s181_s21 = scalar_lea.vmem %s476_s2, %s373_s13 }
  0x11   : > { %v184_v1 = vld [vmem:[%s171_s16] sm:$0xff] }
  0x12   : > { %v186_v2 = vcombine.high %v184_v1, %v184_v1 }
  0x14   : > { %368 = vmatprep.subr.msk.mxu0 %vm191_vm0, %v186_v2 }
  0x15   : > { %369 = vmatpush1.msk.msra.mxu0 %vm191_vm0, %v184_v1 }
  0x16   : > { %370 = vmatmul.mubr.msk.f32.vlgmr.msra.gmra.mrb[0].mxu0 %vm187_vm1, %v183_v3 }
  0xe9   : > { %v262_v4 = vpop.f32.mrb[0].mxu0 }
  0xea   : > { %v264_v5 = vpop.f32.mrb[1].mxu0 }
  0xeb   : > { %v269_v6 = vcombine.low %v262_v4, %v264_v5 }
  0xed   : > { %271 = vst [vmem:[%s181_s21] sm:$0xff] %v269_v6 }
  0xee PF: > { %s12_s11 = sadd.s32 1, %s423_s11   ;;  %s477_s9 = smov %s419_s10 }
  0xef   : > { %p9_p5 = scmp.ge.s32.totalorder %s12_s11, 4   ;;  %s478_s10 = smov %s480_s12 }
  0xf1   :  { %11 = sbr.rel (!%p9_p5) target bundleno = 2 (0x2), region = 58 }

</bundles_post_ra>
